<compile_context>
chip_gen: v7x
topology: tpu7x:2x2x1
jax: 0.10.0
libtpu: 0.0.40
codegen_flags: <defaults>
</compile_context>

<pallas_src>
import functools

import jax
import jax.numpy as jnp
from jax.experimental import pallas as pl
from jax.experimental.pallas import tpu as pltpu

INPUT_DIM = 3
OUTPUT_DIM = 1
H1, H2, H3 = 128, 64, 32
HPAD = 128          # padded feature width for every hidden layer
OUTPAD = 8          # padded sublane width of the transposed mu head
MAX_TB = 1024       # max batch-tile rows (multiple of 128, tiny VMEM footprint)


def _round_up(x, m):
    return ((x + m - 1) // m) * m


def _pad2d(a, rows, cols):
    return jnp.pad(a, ((0, rows - a.shape[0]), (0, cols - a.shape[1])))


_CORES_PER_DEVICE = None


def _cores_per_device():
    """TensorCores per JAX device (used only to gate >=2 grid steps)."""
    global _CORES_PER_DEVICE
    if _CORES_PER_DEVICE is None:
        try:
            d = jax.devices()[0]
            c = getattr(d, "num_cores", None) or getattr(d, "core_count", None)
            _CORES_PER_DEVICE = int(c) if c else 1
        except Exception:
            _CORES_PER_DEVICE = 1
    return _CORES_PER_DEVICE


# --------------------------------------------------------------------------
# Kernel
# --------------------------------------------------------------------------
def policy_mu_kernel(x_ref, w1_ref, b1_ref, w2_ref, b2_ref, w3_ref, b3_ref,
                     wmu_t_ref, bmu_t_ref, out_ref):
    x = x_ref[...]                       # (TB, INPUT_DIM)
    w1 = w1_ref[...]                     # (INPUT_DIM, HPAD)

    # Layer 1: K = INPUT_DIM = 3 -> unrolled VPU broadcast-FMAs (an MXU matmul
    # would be <3% utilized and still pay full push/pop latency).
    h = x[:, 0:1] * w1[0:1, :] + b1_ref[...]
    for k in range(1, INPUT_DIM):
        h = h + x[:, k:k + 1] * w1[k:k + 1, :]
    h = jnp.maximum(h, 0.0)                                          # (TB, 128)

    # Layers 2/3: full 128x128 MXU tiles (zero-padded), f32 accumulation.
    h = jnp.tanh(jnp.dot(h, w2_ref[...],
                         preferred_element_type=jnp.float32) + b2_ref[...])
    h = jnp.tanh(jnp.dot(h, w3_ref[...],
                         preferred_element_type=jnp.float32) + b3_ref[...])

    # Transposed mu head: one XLU transpose (free slot), then a tiny
    # (8,128)@(128,TB) MXU tile.  Row 0 of the output is mu; rows 1..7 are 0.
    h_t = h.T                                                        # (128, TB)
    out_ref[...] = jnp.dot(wmu_t_ref[...], h_t,
                           preferred_element_type=jnp.float32) + bmu_t_ref[...]


# --------------------------------------------------------------------------
# One-time parameter preparation (hoisted out of the per-call path)
# --------------------------------------------------------------------------
def prepare_policy(params):
    """Pad parameters once; returns a pytree used by policy_forward."""
    w1, b1, w2, b2, w3, b3, wmu, bmu, log_std = params
    # All pads are zeros -> padded lanes stay exactly 0 through relu/tanh.
    prepared = dict(
        w1=_pad2d(w1, INPUT_DIM, HPAD),
        b1=_pad2d(b1, 1, HPAD),
        w2=_pad2d(w2, HPAD, HPAD),
        b2=_pad2d(b2, 1, HPAD),
        w3=_pad2d(w3, HPAD, HPAD),
        b3=_pad2d(b3, 1, HPAD),
        wmu_t=_pad2d(wmu.T, OUTPAD, HPAD),     # (8, 128), row 0 = mu weights
        bmu_t=_pad2d(bmu.T, OUTPAD, 1),        # (8, 1),   row 0 = mu bias
        # Batch-independent tail hoisted out of the kernel entirely.
        log_std=2.0 * jax.nn.sigmoid(log_std),          # (1, OUTPUT_DIM)
    )
    prepared["std"] = jnp.exp(prepared["log_std"])
    return prepared


# --------------------------------------------------------------------------
# Forward
# --------------------------------------------------------------------------
@functools.partial(jax.jit, static_argnames=("max_tb",))
def policy_forward(x, prepared, max_tb=MAX_TB):
    """x: (B, INPUT_DIM) float32. Returns (mu, log_std, std), each (B, OUTPUT_DIM)."""
    B = x.shape[0]

    # Balanced batch tiling: never round B up by a whole extra tile.
    n_tiles = pl.cdiv(B, max_tb)
    if B >= 256 and _cores_per_device() >= 2:
        n_tiles = max(n_tiles, 2)        # use both TensorCores on v7x-style chips
    TB = _round_up(pl.cdiv(B, n_tiles), 128)
    B_pad = n_tiles * TB

    x_p = jnp.pad(x, ((0, B_pad - B), (0, 0)))

    const = lambda shape: pl.BlockSpec(shape, lambda i: (0, 0))

    out_pad = pl.pallas_call(
        policy_mu_kernel,
        out_shape=jax.ShapeDtypeStruct((OUTPAD, B_pad), jnp.float32),
        grid_spec=pltpu.PrefetchScalarGridSpec(
            num_scalar_prefetch=0,
            grid=(n_tiles,),
            in_specs=[
                pl.BlockSpec((TB, INPUT_DIM), lambda i: (i, 0)),
                const((INPUT_DIM, HPAD)), const((1, HPAD)),
                const((HPAD, HPAD)), const((1, HPAD)),
                const((HPAD, HPAD)), const((1, HPAD)),
                const((OUTPAD, HPAD)), const((OUTPAD, 1)),
            ],
            out_specs=pl.BlockSpec((OUTPAD, TB), lambda i: (0, i)),
        ),
        compiler_params=pltpu.CompilerParams(
            dimension_semantics=("parallel",)),
    )(x_p, prepared["w1"], prepared["b1"], prepared["w2"], prepared["b2"],
      prepared["w3"], prepared["b3"], prepared["wmu_t"], prepared["bmu_t"])

    mu = out_pad[:OUTPUT_DIM, :B].T                      # (B, OUTPUT_DIM)
    log_std_b = jnp.broadcast_to(prepared["log_std"], mu.shape)
    std_b = jnp.broadcast_to(prepared["std"], mu.shape)
    return mu, log_std_b, std_b


# --------------------------------------------------------------------------
# Init + pure-JAX reference
# --------------------------------------------------------------------------
def init_params(key):
    """Deterministic init mirroring nn.Linear defaults; weights stored as (in, out)."""
    def linear(k, fan_in, fan_out):
        kw, kb = jax.random.split(k)
        bound = 1.0 / jnp.sqrt(fan_in)
        w = jax.random.uniform(kw, (fan_in, fan_out), jnp.float32, -bound, bound)
        b = jax.random.uniform(kb, (1, fan_out), jnp.float32, -bound, bound)
        return w, b

    k1, k2, k3, k4 = jax.random.split(key, 4)
    w1, b1 = linear(k1, INPUT_DIM, H1)
    w2, b2 = linear(k2, H1, H2)
    w3, b3 = linear(k3, H2, H3)
    wmu, bmu = linear(k4, H3, OUTPUT_DIM)
    wmu = wmu * 0.1          # self.mu.weight.data.mul_(0.1)
    bmu = bmu * 0.0          # self.mu.bias.data.mul_(0.0)
    log_std = jnp.zeros((1, OUTPUT_DIM), jnp.float32)
    return (w1, b1, w2, b2, w3, b3, wmu, bmu, log_std)


def policy_reference(x, params):
    w1, b1, w2, b2, w3, b3, wmu, bmu, log_std = params
    h = jnp.maximum(x @ w1 + b1, 0.0)
    h = jnp.tanh(h @ w2 + b2)
    h = jnp.tanh(h @ w3 + b3)
    mu = h @ wmu + bmu
    ls = jnp.broadcast_to(2.0 * jax.nn.sigmoid(log_std), mu.shape)
    return mu, ls, jnp.exp(ls)


if __name__ == "__main__":
    key = jax.random.PRNGKey(0)
    kx, kp = jax.random.split(key)
    params = init_params(kp)
    prepared = prepare_policy(params)          # one-time padding / hoisted tail
    jax.block_until_ready(prepared)

    ok = True
    # (B, max_tb): 8/20 exercise the batch-padding path; (200, 128) exercises
    # the multi-tile grid (n_tiles=2, TB=128, B_pad=256) at a small size.
    for B, max_tb in ((8, MAX_TB), (20, MAX_TB), (200, 128)):
        x = jax.random.normal(jax.random.fold_in(kx, B), (B, INPUT_DIM), jnp.float32)

        mu, log_std, std = policy_forward(x, prepared, max_tb=max_tb)
        jax.block_until_ready((mu, log_std, std))

        mu_r, ls_r, std_r = policy_reference(x, params)
        assert mu.shape == (B, OUTPUT_DIM)
        assert log_std.shape == (B, OUTPUT_DIM)
        assert std.shape == (B, OUTPUT_DIM)
        ok &= bool(jnp.allclose(mu, mu_r, atol=1e-4, rtol=1e-4))
        ok &= bool(jnp.allclose(log_std, ls_r, atol=1e-6, rtol=1e-6))
        ok &= bool(jnp.allclose(std, std_r, atol=1e-6, rtol=1e-6))

    assert ok
    print("KERNEL_OK")
</pallas_src>

<mosaic_0001>
module attributes {stable_mosaic.version = 11 : i64} {
  func.func @policy_mu_kernel(%arg0: i32, %arg1: memref<128x3xf32, #tpu.memory_space<vmem>>, %arg2: memref<3x128xf32, #tpu.memory_space<vmem>>, %arg3: memref<1x128xf32, #tpu.memory_space<vmem>>, %arg4: memref<128x128xf32, #tpu.memory_space<vmem>>, %arg5: memref<1x128xf32, #tpu.memory_space<vmem>>, %arg6: memref<128x128xf32, #tpu.memory_space<vmem>>, %arg7: memref<1x128xf32, #tpu.memory_space<vmem>>, %arg8: memref<8x128xf32, #tpu.memory_space<vmem>>, %arg9: memref<8x1xf32, #tpu.memory_space<vmem>>, %arg10: memref<8x128xf32, #tpu.memory_space<vmem>>) attributes {dimension_semantics = [#tpu.dimension_semantics<parallel>], iteration_bounds = array<i64: 1>, scalar_prefetch = 0 : i64, scratch_operands = 0 : i64, tpu.core_type = #tpu.core_type<tc>, window_params = [{transform_indices = @transform_0, window_bounds = array<i64: 128, 3>}, {pipeline_mode = #tpu.pipeline_mode<synchronous>, transform_indices = @transform_1, window_bounds = array<i64: 3, 128>}, {pipeline_mode = #tpu.pipeline_mode<synchronous>, transform_indices = @transform_2, window_bounds = array<i64: 1, 128>}, {pipeline_mode = #tpu.pipeline_mode<synchronous>, transform_indices = @transform_3, window_bounds = array<i64: 128, 128>}, {pipeline_mode = #tpu.pipeline_mode<synchronous>, transform_indices = @transform_4, window_bounds = array<i64: 1, 128>}, {pipeline_mode = #tpu.pipeline_mode<synchronous>, transform_indices = @transform_5, window_bounds = array<i64: 128, 128>}, {pipeline_mode = #tpu.pipeline_mode<synchronous>, transform_indices = @transform_6, window_bounds = array<i64: 1, 128>}, {pipeline_mode = #tpu.pipeline_mode<synchronous>, transform_indices = @transform_7, window_bounds = array<i64: 8, 128>}, {pipeline_mode = #tpu.pipeline_mode<synchronous>, transform_indices = @transform_8, window_bounds = array<i64: 8, 1>}, {transform_indices = @transform_9, window_bounds = array<i64: 8, 128>}]} {
    %c0 = arith.constant 0 : index
    %c0_0 = arith.constant 0 : index
    %0 = vector.load %arg1[%c0, %c0_0] : memref<128x3xf32, #tpu.memory_space<vmem>>, vector<128x3xf32>
    %c0_1 = arith.constant 0 : index
    %c0_2 = arith.constant 0 : index
    %1 = vector.load %arg2[%c0_1, %c0_2] : memref<3x128xf32, #tpu.memory_space<vmem>>, vector<3x128xf32>
    %2 = vector.extract_strided_slice %0 {offsets = [0, 0], sizes = [128, 1], strides = [1, 1]} : vector<128x3xf32> to vector<128x1xf32>
    %3 = vector.extract_strided_slice %1 {offsets = [0, 0], sizes = [1, 128], strides = [1, 1]} : vector<3x128xf32> to vector<1x128xf32>
    %4 = vector.broadcast %2 : vector<128x1xf32> to vector<128x128xf32>
    %5 = vector.broadcast %3 : vector<1x128xf32> to vector<128x128xf32>
    %6 = arith.mulf %4, %5 : vector<128x128xf32>
    %c0_3 = arith.constant 0 : index
    %c0_4 = arith.constant 0 : index
    %7 = vector.load %arg3[%c0_3, %c0_4] : memref<1x128xf32, #tpu.memory_space<vmem>>, vector<1x128xf32>
    %8 = vector.broadcast %7 : vector<1x128xf32> to vector<128x128xf32>
    %9 = arith.addf %6, %8 : vector<128x128xf32>
    %10 = vector.extract_strided_slice %0 {offsets = [0, 1], sizes = [128, 1], strides = [1, 1]} : vector<128x3xf32> to vector<128x1xf32>
    %11 = vector.extract_strided_slice %1 {offsets = [1, 0], sizes = [1, 128], strides = [1, 1]} : vector<3x128xf32> to vector<1x128xf32>
    %12 = vector.broadcast %10 : vector<128x1xf32> to vector<128x128xf32>
    %13 = vector.broadcast %11 : vector<1x128xf32> to vector<128x128xf32>
    %14 = arith.mulf %12, %13 : vector<128x128xf32>
    %15 = arith.addf %9, %14 : vector<128x128xf32>
    %16 = vector.extract_strided_slice %0 {offsets = [0, 2], sizes = [128, 1], strides = [1, 1]} : vector<128x3xf32> to vector<128x1xf32>
    %17 = vector.extract_strided_slice %1 {offsets = [2, 0], sizes = [1, 128], strides = [1, 1]} : vector<3x128xf32> to vector<1x128xf32>
    %18 = vector.broadcast %16 : vector<128x1xf32> to vector<128x128xf32>
    %19 = vector.broadcast %17 : vector<1x128xf32> to vector<128x128xf32>
    %20 = arith.mulf %18, %19 : vector<128x128xf32>
    %21 = arith.addf %15, %20 : vector<128x128xf32>
    %cst = arith.constant 0.000000e+00 : f32
    %22 = vector.broadcast %cst : f32 to vector<128x128xf32>
    %23 = arith.maximumf %21, %22 : vector<128x128xf32>
    %c0_5 = arith.constant 0 : index
    %c0_6 = arith.constant 0 : index
    %24 = vector.load %arg4[%c0_5, %c0_6] : memref<128x128xf32, #tpu.memory_space<vmem>>, vector<128x128xf32>
    %cst_7 = arith.constant dense<0.000000e+00> : vector<128x128xf32>
    %25 = tpu.matmul %23, %24, %cst_7 {dimension_numbers = #tpu.dot_dimension_numbers<[1], [0], [0], [1], [0, 0, 1, 1], [], []>} : vector<128x128xf32>, vector<128x128xf32>, vector<128x128xf32> -> vector<128x128xf32>
    %c0_8 = arith.constant 0 : index
    %c0_9 = arith.constant 0 : index
    %26 = vector.load %arg5[%c0_8, %c0_9] : memref<1x128xf32, #tpu.memory_space<vmem>>, vector<1x128xf32>
    %27 = vector.broadcast %26 : vector<1x128xf32> to vector<128x128xf32>
    %28 = arith.addf %25, %27 : vector<128x128xf32>
    %29 = math.tanh %28 : vector<128x128xf32>
    %c0_10 = arith.constant 0 : index
    %c0_11 = arith.constant 0 : index
    %30 = vector.load %arg6[%c0_10, %c0_11] : memref<128x128xf32, #tpu.memory_space<vmem>>, vector<128x128xf32>
    %cst_12 = arith.constant dense<0.000000e+00> : vector<128x128xf32>
    %31 = tpu.matmul %29, %30, %cst_12 {dimension_numbers = #tpu.dot_dimension_numbers<[1], [0], [0], [1], [0, 0, 1, 1], [], []>} : vector<128x128xf32>, vector<128x128xf32>, vector<128x128xf32> -> vector<128x128xf32>
    %c0_13 = arith.constant 0 : index
    %c0_14 = arith.constant 0 : index
    %32 = vector.load %arg7[%c0_13, %c0_14] : memref<1x128xf32, #tpu.memory_space<vmem>>, vector<1x128xf32>
    %33 = vector.broadcast %32 : vector<1x128xf32> to vector<128x128xf32>
    %34 = arith.addf %31, %33 : vector<128x128xf32>
    %35 = math.tanh %34 : vector<128x128xf32>
    %36 = tpu.transpose %35, [1, 0] : vector<128x128xf32> -> vector<128x128xf32>
    %c0_15 = arith.constant 0 : index
    %c0_16 = arith.constant 0 : index
    %37 = vector.load %arg8[%c0_15, %c0_16] : memref<8x128xf32, #tpu.memory_space<vmem>>, vector<8x128xf32>
    %cst_17 = arith.constant dense<0.000000e+00> : vector<8x128xf32>
    %38 = tpu.matmul %37, %36, %cst_17 {dimension_numbers = #tpu.dot_dimension_numbers<[1], [0], [0], [1], [0, 0, 1, 1], [], []>} : vector<8x128xf32>, vector<128x128xf32>, vector<8x128xf32> -> vector<8x128xf32>
    %c0_18 = arith.constant 0 : index
    %c0_19 = arith.constant 0 : index
    %39 = vector.load %arg9[%c0_18, %c0_19] : memref<8x1xf32, #tpu.memory_space<vmem>>, vector<8x1xf32>
    %40 = vector.broadcast %39 : vector<8x1xf32> to vector<8x128xf32>
    %41 = arith.addf %38, %40 : vector<8x128xf32>
    %c0_20 = arith.constant 0 : index
    %c0_21 = arith.constant 0 : index
    %42 = vector.load %arg10[%c0_20, %c0_21] : memref<8x128xf32, #tpu.memory_space<vmem>>, vector<8x128xf32>
    tpu.vector_store %arg10[%c0_20, %c0_21], %41 {strides = array<i32>} : memref<8x128xf32, #tpu.memory_space<vmem>>, vector<8x128xf32>,
    return
  }
  func.func @transform_0(%arg0: i32) -> (i32, i32) {
    %c0_i32 = arith.constant 0 : i32
    %c0_i32_0 = arith.constant 0 : i32
    return %arg0, %c0_i32 : i32, i32
  }
  func.func @transform_1(%arg0: i32) -> (i32, i32) {
    %c0_i32 = arith.constant 0 : i32
    %c0_i32_0 = arith.constant 0 : i32
    %c0_i32_1 = arith.constant 0 : i32
    return %c0_i32, %c0_i32_0 : i32, i32
  }
  func.func @transform_2(%arg0: i32) -> (i32, i32) {
    %c0_i32 = arith.constant 0 : i32
    %c0_i32_0 = arith.constant 0 : i32
    %c0_i32_1 = arith.constant 0 : i32
    return %c0_i32, %c0_i32_0 : i32, i32
  }
  func.func @transform_3(%arg0: i32) -> (i32, i32) {
    %c0_i32 = arith.constant 0 : i32
    %c0_i32_0 = arith.constant 0 : i32
    %c0_i32_1 = arith.constant 0 : i32
    return %c0_i32, %c0_i32_0 : i32, i32
  }
  func.func @transform_4(%arg0: i32) -> (i32, i32) {
    %c0_i32 = arith.constant 0 : i32
    %c0_i32_0 = arith.constant 0 : i32
    %c0_i32_1 = arith.constant 0 : i32
    return %c0_i32, %c0_i32_0 : i32, i32
  }
  func.func @transform_5(%arg0: i32) -> (i32, i32) {
    %c0_i32 = arith.constant 0 : i32
    %c0_i32_0 = arith.constant 0 : i32
    %c0_i32_1 = arith.constant 0 : i32
    return %c0_i32, %c0_i32_0 : i32, i32
  }
  func.func @transform_6(%arg0: i32) -> (i32, i32) {
    %c0_i32 = arith.constant 0 : i32
    %c0_i32_0 = arith.constant 0 : i32
    %c0_i32_1 = arith.constant 0 : i32
    return %c0_i32, %c0_i32_0 : i32, i32
  }
  func.func @transform_7(%arg0: i32) -> (i32, i32) {
    %c0_i32 = arith.constant 0 : i32
    %c0_i32_0 = arith.constant 0 : i32
    %c0_i32_1 = arith.constant 0 : i32
    return %c0_i32, %c0_i32_0 : i32, i32
  }
  func.func @transform_8(%arg0: i32) -> (i32, i32) {
    %c0_i32 = arith.constant 0 : i32
    %c0_i32_0 = arith.constant 0 : i32
    %c0_i32_1 = arith.constant 0 : i32
    return %c0_i32, %c0_i32_0 : i32, i32
  }
  func.func @transform_9(%arg0: i32) -> (i32, i32) {
    %c0_i32 = arith.constant 0 : i32
    %c0_i32_0 = arith.constant 0 : i32
    return %c0_i32, %arg0 : i32, i32
  }
}

</mosaic_0001>

<bundles_post_ra>
// kernel: policy_forward.1
= control target key start
LH: loop header
LB: loop body
LE: loop exit
PB: predicated region body
PF: predicated region fallthrough
CT: control target
= control target key end

     0   :  { %14 = vsyncpa [#allocation3], 0  ;;  %s1299_s30 = smov [#allocation2]   ;;  %s1636_s0 = inlined_call_operand.vmem [shape: f32[128,3], index: 0, kind: input, shape index: {}]   ;;  %s1637_s1 = inlined_call_operand.vmem [shape: f32[3,128], index: 1, kind: input, shape index: {}]   ;;  %s1638_s2 = inlined_call_operand.vmem [shape: f32[1,128], index: 2, kind: input, shape index: {}]   ;;  %s1639_s3 = inlined_call_operand.vmem [shape: f32[128,128], index: 3, kind: input, shape index: {}]   ;;  %s1640_s4 = inlined_call_operand.vmem [shape: f32[1,128], index: 4, kind: input, shape index: {}]   ;;  %s1641_s5 = inlined_call_operand.hbm [shape: f32[128,128], index: 5, kind: input, shape index: {}]   ;;  %s1642_s6 = inlined_call_operand.vmem [shape: f32[1,128], index: 6, kind: input, shape index: {}]   ;;  %s1643_s7 = inlined_call_operand.vmem [shape: f32[8,128], index: 7, kind: input, shape index: {}]   ;;  %s1644_s8 = inlined_call_operand.vmem [shape: f32[8,1], index: 8, kind: input, shape index: {}]   ;;  %s1645_s9 = inlined_call_operand.vmem [shape: f32[8,128], index: 9, kind: output, shape index: {}]  }
   0x1   :  { %s30_s10 = sshll.u32 %s1299_s30, 4  ;;  %s1275_s13 = scalar_lea.hbm %s1641_s5, 2048  ;;  %s31_s10 = int_to_ptr.vmem [resolvable:$true] %s30_s10 }
   0x2   :  { %p1276_p0 = scmp.ne.s32.totalorder %s1641_s5, %s1275_s13  ;;  %p1279_p1 = scmp.lt.u32.totalorder %s1275_s13, %s1641_s5 }
   0x4   :  { %p1281_p2 = pnand %p1279_p1, %p1276_p0 }
   0x6   :  { %1284 = shalt.err (!%p1281_p2)
}
   0x7   :  { %s1285_s18 = scalar_lea.vmem %s31_s10, 2048  ;;  %p1290_p4 = scmp.lt.s32.totalorder %s31_s10, %s31_s10 }
   0x8   :  { %p1286_p3 = scmp.ne.s32.totalorder %s31_s10, %s1285_s18  ;;  %p1291_p5 = scmp.lt.s32.totalorder %s1285_s18, %s1285_s18 }
   0xa   :  { %p1292_p6 = por %p1291_p5, %p1290_p4 }
   0xc   :  { %p1293_p7 = pnand %p1292_p6, %p1286_p3 }
   0xe   :  { %1296 = shalt.err (!%p1293_p7)
}
   0xf   :  { %s1300_s19 = smov 128   ;;  %s1301_s20 = smov 8  }
  0x10   :  { %36 = dma.hbm_to_vmem [thread:$0]  %s1641_s5, 2048, %s31_s10, [#allocation3], %s1300_s19, %s1300_s19, %s1301_s20  }
  0x11   :  { %1297 = dma.done.wait [#allocation3], 2048  }
  0x12   :  { %1298 = vsyncadd [#allocation3], 4294965248  ;;  %v1302_v0 = vmov 2   ;;  %v1303_v1 = vmov 1   ;;  %v46_v2 = vld [vmem:[%s1636_s0] sm:$0xff]  ;;  %v48_v3 = vld [vmem:[%s1636_s0 + $0x10] sm:$0xff]  ;;  %v143_v43 = vlaneseq }
  0x13   :  { %1182 = vset.pattern.permute.xlu0 %v1302_v0  ;;  %1181 = vset.pattern.permute.xlu1 %v1303_v1  ;;  %v47_v4 = vld [vmem:[%s1636_s0 + $0x8] sm:$0xff]  ;;  %v402_v5 = vld [vmem:[%s1639_s3] sm:$0xff]  ;;  %v404_v7 = vld [vmem:[%s1639_s3 + $0x10] sm:$0xff]  ;;  %v1304_v15 = vmov 0   ;;  %vm1306_vm0 = vmmov 0  }
  0x14   :  { %287 = vperm.xlu0 %1182, %v46_v2   ;;  %187 = vperm.xlu1 %1181, %v46_v2   ;;  %v403_v6 = vld [vmem:[%s1639_s3 + $0x8] sm:$0xff]  ;;  %v405_v8 = vld [vmem:[%s1639_s3 + $0x18] sm:$0xff]  ;;  %v50_v9 = vld [vmem:[%s1636_s0 + $0x20] sm:$0xff]  ;;  %v144_v46 = vshrl.u32 %v143_v43, 7 }
  0x15   :  { %v1084_v10 = vpack.c.bf16 %v403_v6, %v402_v5  ;;  %v1088_v11 = vpack.c.bf16 %v405_v8, %v404_v7  ;;  %v406_v12 = vld [vmem:[%s1639_s3 + $0x20] sm:$0xff]  ;;  %v407_v13 = vld [vmem:[%s1639_s3 + $0x28] sm:$0xff]  ;;  %v408_v16 = vld [vmem:[%s1639_s3 + $0x30] sm:$0xff] }
  0x16   :  { %v1092_v14 = vpack.c.bf16 %v407_v13, %v406_v12  ;;  %v409_v17 = vld [vmem:[%s1639_s3 + $0x38] sm:$0xff]  ;;  %v410_v19 = vld [vmem:[%s1639_s3 + $0x40] sm:$0xff]  ;;  %v411_v20 = vld [vmem:[%s1639_s3 + $0x48] sm:$0xff]  ;;  %v145_v49 = vsub.s32 0, %v144_v46  ;;  %v252_v50 = vsub.s32 1, %v144_v46  ;;  %v352_v54 = vsub.s32 2, %v144_v46 }
  0x17   :  { %1085 = vmatprep.subr.bf16.mxu1 %v1084_v10  ;;  %v1096_v18 = vpack.c.bf16 %v409_v17, %v408_v16  ;;  %v49_v21 = vld [vmem:[%s1636_s0 + $0x18] sm:$0xff]  ;;  %v1100_v22 = vpack.c.bf16 %v411_v20, %v410_v19  ;;  %v412_v23 = vld [vmem:[%s1639_s3 + $0x50] sm:$0xff]  ;;  %v51_v25 = vld [vmem:[%s1636_s0 + $0x28] sm:$0xff] }
  0x18   :  { %295 = vperm.xlu0 %1182, %v48_v3   ;;  %191 = vperm.xlu1 %1181, %v47_v4   ;;  %v413_v24 = vld [vmem:[%s1639_s3 + $0x58] sm:$0xff]  ;;  %v414_v27 = vld [vmem:[%s1639_s3 + $0x60] sm:$0xff]  ;;  %v415_v28 = vld [vmem:[%s1639_s3 + $0x68] sm:$0xff] }
  0x19   :  { %1087 = vmatpush3.bf16.msra.mxu1 %v1084_v10  ;;  %v1104_v26 = vpack.c.bf16 %v413_v24, %v412_v23  ;;  %v53_v29 = vld [vmem:[%s1636_s0 + $0x38] sm:$0xff]  ;;  %v1108_v30 = vpack.c.bf16 %v415_v28, %v414_v27  ;;  %v416_v31 = vld [vmem:[%s1639_s3 + $0x70] sm:$0xff]  ;;  %v55_v33 = vld [vmem:[%s1636_s0 + $0x48] sm:$0xff] }
  0x1a   :  { %1089 = vmatprep.subr.bf16.mxu1 %v1088_v11  ;;  %v417_v32 = vld [vmem:[%s1639_s3 + $0x78] sm:$0xff]  ;;  %v52_v36 = vld [vmem:[%s1636_s0 + $0x30] sm:$0xff]  ;;  %v54_v37 = vld [vmem:[%s1636_s0 + $0x40] sm:$0xff] }
  0x1b   :  { %v1112_v34 = vpack.c.bf16 %v417_v32, %v416_v31  ;;  %v57_v35 = vld [vmem:[%s1636_s0 + $0x58] sm:$0xff]  ;;  %v56_v38 = vld [vmem:[%s1636_s0 + $0x50] sm:$0xff]  ;;  %v58_v39 = vld [vmem:[%s1636_s0 + $0x60] sm:$0xff] }
  0x1c   :  { %303 = vperm.xlu0 %1182, %v50_v9   ;;  %1183 = vset.pattern.permute.xlu1 %v1302_v0  ;;  %v59_v40 = vld [vmem:[%s1636_s0 + $0x68] sm:$0xff]  ;;  %v61_v41 = vld [vmem:[%s1636_s0 + $0x78] sm:$0xff]  ;;  %v60_v42 = vld [vmem:[%s1636_s0 + $0x70] sm:$0xff] }
  0x1d   :  { %291 = vperm.xlu1 %1183, %v47_v4   ;;  %1091 = vmatpush3.bf16.msra.mxu1 %v1088_v11  ;;  %v62_v52 = vld [vmem:[%s1637_s1] sm:$0x7]  ;;  %v587_v16 = vld [vmem:[#allocation2 + $0x8] sm:$0xff]  ;;  %v589_v23 = vld [vmem:[#allocation2 + $0x18] sm:$0xff] }
  0x1e   :  { %1093 = vmatprep.subr.bf16.mxu1 %v1092_v14  ;;  %v1499_v55 = vrot.slane %v62_v52, %v145_v49  ;;  %v1501_v56 = vrot.slane %v62_v52, %v252_v50  ;;  %v1506_v57 = vld [vmem:[%s1638_s2] ss:$0 sm:$0xff]  ;;  %v1508_v59 = vrot.slane %v62_v52, %v352_v54  ;;  %v591_v32 = vld [vmem:[#allocation2 + $0x28] sm:$0xff] }
  0x1f   :  { %v590_v31 = vld [vmem:[#allocation2 + $0x20] sm:$0xff] }
  0x20   :  { %1189 = vset.pattern.permute.xlu0 %v1304_v15 }
  0x21   :  { %65 = vperm.xlu0 %1189, %v46_v2   ;;  %1184 = vset.pattern.permute.xlu1 %v1304_v15 }
  0x22   :  { %75 = vperm.xlu1 %1184, %v48_v3   ;;  %1095 = vmatpush3.bf16.msra.mxu1 %v1092_v14  ;;  %v586_v14 = vld [vmem:[#allocation2] sm:$0xff] }
  0x23   :  { %1097 = vmatprep.subr.bf16.mxu1 %v1096_v18 }
  0x25   :  { %70 = vperm.xlu0 %1189, %v47_v4  }
  0x26   :  { %1185 = vset.pattern.permute.xlu1 %v1303_v1  ;;  %1099 = vmatpush3.bf16.msra.mxu1 %v1096_v18 }
  0x27   :  { %195 = vperm.xlu1 %1185, %v48_v3   ;;  %1101 = vmatprep.subr.bf16.mxu1 %v1100_v22 }
  0x29   :  { %80 = vperm.xlu0 %1189, %v49_v21  }
  0x2a   :  { %1103 = vmatpush3.bf16.msra.mxu1 %v1100_v22  ;;  %v1116_v22 = vpack.c.bf16 %v587_v16, %v586_v14 }
  0x2b   :  { %199 = vperm.xlu1 %1185, %v49_v21   ;;  %1105 = vmatprep.subr.bf16.mxu1 %v1104_v26 }
  0x2d   :  { %90 = vperm.xlu0 %1189, %v51_v25  }
  0x2e   :  { %1107 = vmatpush3.bf16.msra.mxu1 %v1104_v26 }
  0x2f   :  { %1186 = vset.pattern.permute.xlu1 %v1302_v0  ;;  %1109 = vmatprep.subr.bf16.mxu1 %v1108_v30 }
  0x30   :  { %299 = vperm.xlu1 %1186, %v49_v21  }
  0x31   :  { %100 = vperm.xlu0 %1189, %v53_v29  }
  0x32   :  { %1111 = vmatpush3.bf16.msra.mxu1 %v1108_v30 }
  0x33   :  { %1113 = vmatprep.subr.bf16.mxu1 %v1112_v34 }
  0x34   :  { %1187 = vset.pattern.permute.xlu1 %v1304_v15 }
  0x35   :  { %85 = vperm.xlu1 %1187, %v50_v9   ;;  %110 = vperm.xlu0 %1189, %v55_v33  }
  0x36   :  { %1115 = vmatpush3.bf16.msra.mxu1 %v1112_v34 }
  0x37   :  { %1117 = vmatprep.subr.bf16.mxu1 %v1116_v22 }
  0x39   :  { %1188 = vset.pattern.permute.xlu1 %v1303_v1  ;;  %120 = vperm.xlu0 %1189, %v57_v35  }
  0x3a   :  { %203 = vperm.xlu1 %1188, %v50_v9  }
  0x3d   :  { %1198 = vset.pattern.permute.xlu0 %v1302_v0 }
  0x3e   :  { %207 = vperm.xlu1 %1188, %v51_v25   ;;  %311 = vperm.xlu0 %1198, %v52_v36  }
  0x42   :  { %1190 = vset.pattern.permute.xlu1 %v1302_v0  ;;  %319 = vperm.xlu0 %1198, %v54_v37  }
  0x43   :  { %307 = vperm.xlu1 %1190, %v51_v25  }
  0x46   :  { %327 = vperm.xlu0 %1198, %v56_v38  }
  0x47   :  { %1191 = vset.pattern.permute.xlu1 %v1304_v15 }
  0x48   :  { %95 = vperm.xlu1 %1191, %v52_v36  }
  0x4a   :  { %335 = vperm.xlu0 %1198, %v58_v39  }
  0x4c   :  { %1192 = vset.pattern.permute.xlu1 %v1303_v1 }
  0x4d   :  { %211 = vperm.xlu1 %1192, %v52_v36   ;;  %v1124_v36 = vpack.c.bf16 %v591_v32, %v590_v31 }
  0x4e   :  { %1203 = vset.pattern.permute.xlu0 %v1304_v15 }
  0x4f   :  { %130 = vperm.xlu0 %1203, %v59_v40  }
  0x51   :  { %215 = vperm.xlu1 %1192, %v53_v29  }
  0x53   :  { %140 = vperm.xlu0 %1203, %v61_v41  }
  0x55   :  { %1193 = vset.pattern.permute.xlu1 %v1302_v0 }
  0x56   :  { %315 = vperm.xlu1 %1193, %v53_v29  }
  0x57   :  { %1207 = vset.pattern.permute.xlu0 %v1302_v0 }
  0x58   :  { %343 = vperm.xlu0 %1207, %v60_v42  }
  0x5a   :  { %1194 = vset.pattern.permute.xlu1 %v1304_v15 }
  0x5b   :  { %105 = vperm.xlu1 %1194, %v54_v37  }
  0x5c   :  { %1210 = vset.pattern.permute.xlu0 %v1304_v15 }
  0x5f   :  { %1195 = vset.pattern.permute.xlu1 %v1303_v1 }
  0x60   :  { %219 = vperm.xlu1 %1195, %v54_v37  }
  0x64   :  { %223 = vperm.xlu1 %1195, %v55_v33  }
  0x68   :  { %1196 = vset.pattern.permute.xlu1 %v1302_v0 }
  0x69   :  { %323 = vperm.xlu1 %1196, %v55_v33  }
  0x6d   :  { %1197 = vset.pattern.permute.xlu1 %v1304_v15 }
  0x6e   :  { %115 = vperm.xlu1 %1197, %v56_v38  }
  0x72   :  { %1199 = vset.pattern.permute.xlu1 %v1303_v1 }
  0x73   :  { %227 = vperm.xlu1 %1199, %v56_v38   ;;  %v592_v38 = vld [vmem:[#allocation2 + $0x30] sm:$0xff] }
  0x77   :  { %231 = vperm.xlu1 %1199, %v57_v35  }
  0x7b   :  { %1200 = vset.pattern.permute.xlu1 %v1302_v0 }
  0x7c   :  { %331 = vperm.xlu1 %1200, %v57_v35  }
  0x80   :  { %1201 = vset.pattern.permute.xlu1 %v1304_v15 }
  0x81   :  { %125 = vperm.xlu1 %1201, %v58_v39  }
  0x85   :  { %1202 = vset.pattern.permute.xlu1 %v1303_v1 }
  0x86   :  { %235 = vperm.xlu1 %1202, %v58_v39   ;;  %v593_v39 = vld [vmem:[#allocation2 + $0x38] sm:$0xff] }
  0x87   :  { %v1128_v43 = vpack.c.bf16 %v593_v39, %v592_v38 }
  0x8a   :  { %239 = vperm.xlu1 %1202, %v59_v40  }
  0x8e   :  { %1204 = vset.pattern.permute.xlu1 %v1302_v0 }
  0x8f   :  { %339 = vperm.xlu1 %1204, %v59_v40  }
  0x93   :  { %1205 = vset.pattern.permute.xlu1 %v1304_v15  ;;  %v188_v44 = vpop.permute.xlu1 %187  ;;  %v288_v45 = vpop.permute.xlu0 %287 }
  0x94   :  { %135 = vperm.xlu1 %1205, %v60_v42   ;;  %v254_v62 = vmul.f32 %v1501_v56, %v188_v44  ;;  %v354_v63 = vmul.f32 %v1508_v59, %v288_v45 }
  0x97   :  { %v192_v47 = vpop.permute.xlu1 %191  ;;  %v296_v48 = vpop.permute.xlu0 %295 }
  0x98   :  { %1206 = vset.pattern.permute.xlu1 %v1303_v1  ;;  %v255_v6 = vmul.f32 %v1501_v56, %v192_v47  ;;  %v356_v7 = vmul.f32 %v1508_v59, %v296_v48 }
  0x99   :  { %243 = vperm.xlu1 %1206, %v60_v42  }
  0x9b   :  { %v1494_v51 = vpop.permute.xlu0 %303 }
  0x9c   :  { %v292_v53 = vpop.permute.xlu1 %291  ;;  %v358_v47 = vmul.f32 %v1508_v59, %v1494_v51 }
  0x9d   :  { %247 = vperm.xlu1 %1206, %v61_v41   ;;  %v355_v12 = vmul.f32 %v1508_v59, %v292_v53 }
  0xa0   :  { %v66_v58 = vpop.permute.xlu0 %65 }
  0xa1   :  { %v147_v60 = vmul.f32 %v1499_v55, %v66_v58  ;;  %1208 = vset.pattern.permute.xlu1 %v1302_v0  ;;  %v76_v61 = vpop.permute.xlu1 %75 }
  0xa2   :  { %347 = vperm.xlu1 %1208, %v61_v41   ;;  %v149_v2 = vmul.f32 %v1499_v55, %v76_v61 }
  0xa3   :  { %v170_v1 = vadd.f32 %v1506_v57, %v147_v60 }
  0xa4   :  { %v71_v3 = vpop.permute.xlu0 %70  ;;  %v172_v0 = vadd.f32 %v1506_v57, %v149_v2 }
  0xa5   :  { %v148_v4 = vmul.f32 %v1499_v55, %v71_v3  ;;  %v270_v5 = vadd.f32 %v254_v62, %v170_v1 }
  0xa6   :  { %v196_v8 = vpop.permute.xlu1 %195  ;;  %1209 = vset.pattern.permute.xlu1 %v1304_v15  ;;  %v588_v15 = vld [vmem:[#allocation2 + $0x10] sm:$0xff] }
  0xa7   :  { %v171_v9 = vadd.f32 %v1506_v57, %v148_v4  ;;  %v256_v10 = vmul.f32 %v1501_v56, %v196_v8  ;;  %v370_v11 = vadd.f32 %v354_v63, %v270_v5  ;;  %v1120_v30 = vpack.c.bf16 %v589_v23, %v588_v15 }
  0xa8   :  { %v81_v13 = vpop.permute.xlu0 %80 }
  0xa9   :  { %v271_v17 = vadd.f32 %v255_v6, %v171_v9  ;;  %v272_v18 = vadd.f32 %v256_v10, %v172_v0  ;;  %v150_v19 = vmul.f32 %v1499_v55, %v81_v13  ;;  %v386_v20 = vmax.f32 %v370_v11, 0.0 }
  0xaa   :  { %v200_v21 = vpop.permute.xlu1 %199 }
  0xab   :  { %969 = vmatprep.mubr.f32.mxu1 %v386_v20  ;;  %v371_v24 = vadd.f32 %v355_v12, %v271_v17  ;;  %v372_v25 = vadd.f32 %v356_v7, %v272_v18  ;;  %v173_v26 = vadd.f32 %v1506_v57, %v150_v19  ;;  %v257_v27 = vmul.f32 %v1501_v56, %v200_v21 }
  0xac   :  { %v91_v42 = vpop.permute.xlu0 %90 }
  0xad   :  { %v387_v28 = vmax.f32 %v371_v24, 0.0  ;;  %v388_v29 = vmax.f32 %v372_v25, 0.0  ;;  %v273_v34 = vadd.f32 %v257_v27, %v173_v26  ;;  %v152_v50 = vmul.f32 %v1499_v55, %v91_v42 }
  0xaf   :  { %970 = vmatmul.mubr.f32.vlgmr.msra.gmra.mrb[0].mxu1 %v387_v28  ;;  %v300_v33 = vpop.permute.xlu1 %299  ;;  %v175_v60 = vadd.f32 %v1506_v57, %v152_v50 }
  0xb0   :  { %v357_v35 = vmul.f32 %v1508_v59, %v300_v33  ;;  %972 = vmatprep.mubr.f32.mxu1 %v388_v29  ;;  %1119 = vmatpush3.bf16.msra.mxu1 %v1116_v22  ;;  %v101_v45 = vpop.permute.xlu0 %100 }
  0xb1   :  { %1121 = vmatprep.subr.bf16.mxu1 %v1120_v30  ;;  %v154_v11 = vmul.f32 %v1499_v55, %v101_v45 }
  0xb2   :  { %v373_v37 = vadd.f32 %v357_v35, %v273_v34 }
  0xb3   :  { %v177_v16 = vadd.f32 %v1506_v57, %v154_v11 }
  0xb4   :  { %v389_v40 = vmax.f32 %v373_v37, 0.0  ;;  %v86_v41 = vpop.permute.xlu1 %85  ;;  %1123 = vmatpush3.bf16.msra.mxu1 %v1120_v30  ;;  %v111_v58 = vpop.permute.xlu0 %110 }
  0xb5   :  { %1125 = vmatprep.subr.bf16.mxu1 %v1124_v36  ;;  %v151_v44 = vmul.f32 %v1499_v55, %v86_v41  ;;  %v156_v30 = vmul.f32 %v1499_v55, %v111_v58 }
  0xb6   :  { %973 = vmatmul.mubr.f32.gmra.mrb[2].mxu1 %v389_v40 }
  0xb7   :  { %v174_v48 = vadd.f32 %v1506_v57, %v151_v44  ;;  %v179_v34 = vadd.f32 %v1506_v57, %v156_v30 }
  0xb8   :  { %1127 = vmatpush3.bf16.msra.mxu1 %v1124_v36  ;;  %v121_v2 = vpop.permute.xlu0 %120 }
  0xb9   :  { %v204_v46 = vpop.permute.xlu1 %203  ;;  %1129 = vmatprep.subr.bf16.mxu1 %v1128_v43  ;;  %v158_v50 = vmul.f32 %v1499_v55, %v121_v2 }
  0xba   :  { %v258_v49 = vmul.f32 %v1501_v56, %v204_v46 }
  0xbc   :  { %v274_v52 = vadd.f32 %v258_v49, %v174_v48  ;;  %1131 = vmatpush3.bf16.msra.mxu1 %v1128_v43 }
  0xbd   :  { %v208_v53 = vpop.permute.xlu1 %207  ;;  %v312_v7 = vpop.permute.xlu0 %311 }
  0xbe   :  { %v374_v54 = vadd.f32 %v358_v47, %v274_v52  ;;  %v259_v61 = vmul.f32 %v1501_v56, %v208_v53  ;;  %v360_v10 = vmul.f32 %v1508_v59, %v312_v7 }
  0xc0   :  { %v390_v62 = vmax.f32 %v374_v54, 0.0  ;;  %v275_v1 = vadd.f32 %v259_v61, %v175_v60  ;;  %v181_v60 = vadd.f32 %v1506_v57, %v158_v50 }
  0xc1   :  { %v320_v25 = vpop.permute.xlu0 %319 }
  0xc2   :  { %975 = vmatprep.mubr.f32.mxu1 %v390_v62  ;;  %v308_v63 = vpop.permute.xlu1 %307  ;;  %v362_v29 = vmul.f32 %v1508_v59, %v320_v25  ;;  %v601_v25 = vld [vmem:[#allocation2 + $0x78] sm:$0xff] }
  0xc3   :  { %v359_v51 = vmul.f32 %v1508_v59, %v308_v63 }
  0xc5   :  { %v375_v3 = vadd.f32 %v359_v51, %v275_v1  ;;  %v328_v44 = vpop.permute.xlu0 %327  ;;  %v594_v51 = vld [vmem:[#allocation2 + $0x40] sm:$0xff] }
  0xc6   :  { %v364_v48 = vmul.f32 %v1508_v59, %v328_v44 }
  0xc7   :  { %v391_v4 = vmax.f32 %v375_v3, 0.0  ;;  %v96_v5 = vpop.permute.xlu1 %95  ;;  %v595_v3 = vld [vmem:[#allocation2 + $0x48] sm:$0xff] }
  0xc8   :  { %v153_v6 = vmul.f32 %v1499_v55, %v96_v5  ;;  %v1132_v7 = vpack.c.bf16 %v595_v3, %v594_v51 }
  0xc9   :  { %976 = vmatmul.mubr.f32.gmra.mrb[4].mxu1 %v391_v4  ;;  %v336_v5 = vpop.permute.xlu0 %335 }
  0xca   :  { %v176_v0 = vadd.f32 %v1506_v57, %v153_v6  ;;  %1133 = vmatprep.subr.bf16.mxu1 %v1132_v7 }
  0xcb   :  { %1135 = vmatpush3.bf16.msra.mxu1 %v1132_v7 }
  0xcc   :  { %v212_v8 = vpop.permute.xlu1 %211 }
  0xcd   :  { %v260_v9 = vmul.f32 %v1501_v56, %v212_v8  ;;  %v596_v8 = vld [vmem:[#allocation2 + $0x50] sm:$0xff] }
  0xcf   :  { %v276_v12 = vadd.f32 %v260_v9, %v176_v0  ;;  %v597_v0 = vld [vmem:[#allocation2 + $0x58] sm:$0xff]  ;;  %v131_v9 = vpop.permute.xlu0 %130 }
  0xd0   :  { %v216_v13 = vpop.permute.xlu1 %215 }
  0xd1   :  { %v376_v14 = vadd.f32 %v360_v10, %v276_v12  ;;  %v261_v17 = vmul.f32 %v1501_v56, %v216_v13  ;;  %v1136_v10 = vpack.c.bf16 %v597_v0, %v596_v8 }
  0xd3   :  { %v392_v18 = vmax.f32 %v376_v14, 0.0  ;;  %v277_v20 = vadd.f32 %v261_v17, %v177_v16  ;;  %1137 = vmatprep.subr.bf16.mxu1 %v1136_v10  ;;  %v160_v14 = vmul.f32 %v1499_v55, %v131_v9  ;;  %v598_v16 = vld [vmem:[#allocation2 + $0x60] sm:$0xff]  ;;  %v599_v17 = vld [vmem:[#allocation2 + $0x68] sm:$0xff] }
  0xd4   :  { %1139 = vmatpush3.bf16.msra.mxu1 %v1136_v10 }
  0xd5   :  { %978 = vmatprep.mubr.f32.mxu1 %v392_v18  ;;  %v316_v19 = vpop.permute.xlu1 %315  ;;  %v366_v18 = vmul.f32 %v1508_v59, %v336_v5 }
  0xd6   :  { %v361_v21 = vmul.f32 %v1508_v59, %v316_v19 }
  0xd8   :  { %v377_v22 = vadd.f32 %v361_v21, %v277_v20  ;;  %v1140_v20 = vpack.c.bf16 %v599_v17, %v598_v16 }
  0xda   :  { %v393_v15 = vmax.f32 %v377_v22, 0.0  ;;  %v106_v23 = vpop.permute.xlu1 %105  ;;  %1141 = vmatprep.subr.bf16.mxu1 %v1140_v20 }
  0xdb   :  { %v155_v24 = vmul.f32 %v1499_v55, %v106_v23  ;;  %1143 = vmatpush3.bf16.msra.mxu1 %v1140_v20 }
  0xdc   :  { %979 = vmatmul.mubr.f32.gmra.mrb[6].mxu1 %v393_v15  ;;  %v183_v15 = vadd.f32 %v1506_v57, %v160_v14 }
  0xdd   :  { %v178_v27 = vadd.f32 %v1506_v57, %v155_v24  ;;  %v600_v24 = vld [vmem:[#allocation2 + $0x70] sm:$0xff] }
  0xdf   :  { %v220_v26 = vpop.permute.xlu1 %219 }
  0xe0   :  { %v262_v28 = vmul.f32 %v1501_v56, %v220_v26 }
  0xe2   :  { %v278_v31 = vadd.f32 %v262_v28, %v178_v27  ;;  %v1144_v27 = vpack.c.bf16 %v601_v25, %v600_v24 }
  0xe3   :  { %v224_v32 = vpop.permute.xlu1 %223 }
  0xe4   :  { %v378_v33 = vadd.f32 %v362_v29, %v278_v31  ;;  %v263_v35 = vmul.f32 %v1501_v56, %v224_v32  ;;  %1145 = vmatprep.subr.bf16.mxu1 %v1144_v27  ;;  %v141_v31 = vpop.permute.xlu0 %140 }
  0xe5   :  { %1147 = vmatpush3.bf16.msra.mxu1 %v1144_v27 }
  0xe6   :  { %v394_v36 = vmax.f32 %v378_v33, 0.0  ;;  %v279_v38 = vadd.f32 %v263_v35, %v179_v34 }
  0xe8   :  { %981 = vmatprep.mubr.f32.mxu1 %v394_v36  ;;  %v324_v37 = vpop.permute.xlu1 %323  ;;  %v344_v36 = vpop.permute.xlu0 %343 }
  0xe9   :  { %v363_v39 = vmul.f32 %v1508_v59, %v324_v37 }
  0xeb   :  { %v379_v40 = vadd.f32 %v363_v39, %v279_v38 }
  0xed   :  { %v395_v41 = vmax.f32 %v379_v40, 0.0  ;;  %v116_v42 = vpop.permute.xlu1 %115  ;;  %v368_v40 = vmul.f32 %v1508_v59, %v344_v36 }
  0xee   :  { %v157_v43 = vmul.f32 %v1499_v55, %v116_v42  ;;  %v162_v42 = vmul.f32 %v1499_v55, %v141_v31 }
  0xef   :  { %982 = vmatmul.mubr.f32.gmra.mrb[8].mxu1 %v395_v41 }
  0xf0   :  { %v180_v46 = vadd.f32 %v1506_v57, %v157_v43 }
  0xf2   :  { %v228_v45 = vpop.permute.xlu1 %227 }
  0xf3   :  { %v264_v47 = vmul.f32 %v1501_v56, %v228_v45 }
  0xf5   :  { %v280_v49 = vadd.f32 %v264_v47, %v180_v46  ;;  %v185_v47 = vadd.f32 %v1506_v57, %v162_v42 }
  0xf6   :  { %v232_v52 = vpop.permute.xlu1 %231 }
  0xf7   :  { %v380_v53 = vadd.f32 %v364_v48, %v280_v49  ;;  %v265_v54 = vmul.f32 %v1501_v56, %v232_v52 }
  0xf9   :  { %v396_v58 = vmax.f32 %v380_v53, 0.0  ;;  %v281_v62 = vadd.f32 %v265_v54, %v181_v60  ;;  %v1580_v54 = vld [vmem:[%s1640_s4] ss:$0 sm:$0xff] }
  0xfb   :  { %984 = vmatprep.mubr.f32.mxu1 %v396_v58  ;;  %v332_v61 = vpop.permute.xlu1 %331 }
  0xfc   :  { %v365_v63 = vmul.f32 %v1508_v59, %v332_v61 }
  0xfe   :  { %v381_v1 = vadd.f32 %v365_v63, %v281_v62 }
 0x100   :  { %v397_v4 = vmax.f32 %v381_v1, 0.0  ;;  %v126_v6 = vpop.permute.xlu1 %125 }
 0x101   :  { %v159_v2 = vmul.f32 %v1499_v55, %v126_v6 }
 0x102   :  { %985 = vmatmul.mubr.f32.gmra.mrb[10].mxu1 %v397_v4 }
 0x103   :  { %v182_v12 = vadd.f32 %v1506_v57, %v159_v2 }
 0x105   :  { %v236_v11 = vpop.permute.xlu1 %235 }
 0x106   :  { %v266_v13 = vmul.f32 %v1501_v56, %v236_v11 }
 0x108   :  { %v282_v19 = vadd.f32 %v266_v13, %v182_v12 }
 0x109   :  { %v240_v21 = vpop.permute.xlu1 %239 }
 0x10a   :  { %v382_v22 = vadd.f32 %v366_v18, %v282_v19  ;;  %v267_v23 = vmul.f32 %v1501_v56, %v240_v21 }
 0x10c   :  { %v398_v26 = vmax.f32 %v382_v22, 0.0  ;;  %v283_v29 = vadd.f32 %v267_v23, %v183_v15 }
 0x10e   :  { %987 = vmatprep.mubr.f32.mxu1 %v398_v26  ;;  %v340_v28 = vpop.permute.xlu1 %339 }
 0x10f   :  { %v367_v30 = vmul.f32 %v1508_v59, %v340_v28 }
 0x111   :  { %v383_v32 = vadd.f32 %v367_v30, %v283_v29  ;;  %v1305_v30 = vmov 0.0|0.0  }
 0x112   :  { %1148 = vmatprep.subr.bf16.mxu0 %v1305_v30 }
 0x113   :  { %v399_v33 = vmax.f32 %v383_v32, 0.0  ;;  %v136_v34 = vpop.permute.xlu1 %135 }
 0x114   :  { %v161_v35 = vmul.f32 %v1499_v55, %v136_v34 }
 0x115   :  { %988 = vmatmul.mubr.f32.gmra.mrb[12].mxu1 %v399_v33 }
 0x116   :  { %v184_v38 = vadd.f32 %v1506_v57, %v161_v35 }
 0x118   :  { %v244_v37 = vpop.permute.xlu1 %243 }
 0x119   :  { %v268_v39 = vmul.f32 %v1501_v56, %v244_v37 }
 0x11b   :  { %v284_v41 = vadd.f32 %v268_v39, %v184_v38  ;;  %v1602_v39 = vld [vmem:[%s1642_s6] ss:$0 sm:$0xff] }
 0x11c   :  { %v248_v43 = vpop.permute.xlu1 %247 }
 0x11d   :  { %v384_v44 = vadd.f32 %v368_v40, %v284_v41  ;;  %v269_v45 = vmul.f32 %v1501_v56, %v248_v43 }
 0x11f   :  { %v400_v46 = vmax.f32 %v384_v44, 0.0  ;;  %v285_v49 = vadd.f32 %v269_v45, %v185_v47 }
 0x121   :  { %990 = vmatprep.mubr.f32.mxu1 %v400_v46  ;;  %v348_v48 = vpop.permute.xlu1 %347 }
 0x122   :  { %v369_v50 = vmul.f32 %v1508_v59, %v348_v48  ;;  %v1307_v48 = vmov 0.0  }
 0x123   :  { %1081 = vmatprep.mubr.msk.f32.mxu0 %vm1306_vm0, %v1307_v48 }
 0x124   :  { %v385_v52 = vadd.f32 %v369_v50, %v285_v49 }
 0x126   :  { %v401_v53 = vmax.f32 %v385_v52, 0.0 }
 0x128   :  { %991 = vmatmul.mubr.f32.gmra.mrb[14].mxu1 %v401_v53  ;;  %v771_v53 = vld [vmem:[%s1644_s8] sm:$0xff] }
 0x129   :  { %774 = vperm.xlu1 %1209, %v771_v53  }
 0x182   :  { %v971_v55 = vpop.f32.mrb[0].mxu1 }
 0x183   :  { %v497_v58 = vadd.f32 %v971_v55, %v1580_v54  ;;  %v491_v56 = vpop.f32.mrb[1].mxu1 }
 0x184   :  { %v492_v60 = vadd.f32 %v1580_v54, %v491_v56 }
 0x186   :  { %1211 = vtanh.f32 %v492_v60 }
 0x187   :  { %1213 = vtanh.f32 %v497_v58 }
 0x189   :  { %v974_v57 = vpop.f32.mrb[2].mxu1 }
 0x18a   :  { %v507_v61 = vadd.f32 %v974_v57, %v1580_v54  ;;  %v501_v59 = vpop.f32.mrb[3].mxu1 }
 0x18b   :  { %v502_v62 = vadd.f32 %v1580_v54, %v501_v59 }
 0x18d   :  { %1215 = vtanh.f32 %v502_v62 }
 0x18e   :  { %1217 = vtanh.f32 %v507_v61 }
 0x190   :  { %v1212_v63 = vpop.eup %1211 }
 0x191   :  { %v1214_v1 = vpop.eup %1213  ;;  %1025 = vmatprep.mubr.f32.mxu1 %v1212_v63 }
 0x192   :  { %1026 = vmatmul.mubr.f32.vlgmr.msra.gmra.mrb[16].mxu1 %v1214_v1 }
 0x197   :  { %v1216_v51 = vpop.eup %1215 }
 0x198   :  { %v1218_v3 = vpop.eup %1217  ;;  %1028 = vmatprep.mubr.f32.mxu1 %v1216_v51 }
 0x199   :  { %1029 = vmatmul.mubr.f32.gmra.mrb[18].mxu1 %v1218_v3 }
 0x19c   :  { %v977_v4 = vpop.f32.mrb[4].mxu1 }
 0x19d   :  { %v517_v5 = vadd.f32 %v977_v4, %v1580_v54  ;;  %v511_v6 = vpop.f32.mrb[5].mxu1 }
 0x19e   :  { %v512_v7 = vadd.f32 %v1580_v54, %v511_v6 }
 0x1a0   :  { %1219 = vtanh.f32 %v512_v7 }
 0x1a1   :  { %1221 = vtanh.f32 %v517_v5 }
 0x1aa   :  { %v1220_v2 = vpop.eup %1219 }
 0x1ab   :  { %v1222_v8 = vpop.eup %1221  ;;  %1031 = vmatprep.mubr.f32.mxu1 %v1220_v2 }
 0x1ac   :  { %1032 = vmatmul.mubr.f32.gmra.mrb[20].mxu1 %v1222_v8 }
 0x1af   :  { %v980_v0 = vpop.f32.mrb[6].mxu1 }
 0x1b0   :  { %v527_v9 = vadd.f32 %v980_v0, %v1580_v54  ;;  %v521_v10 = vpop.f32.mrb[7].mxu1 }
 0x1b1   :  { %v522_v11 = vadd.f32 %v1580_v54, %v521_v10 }
 0x1b3   :  { %1223 = vtanh.f32 %v522_v11 }
 0x1b4   :  { %1225 = vtanh.f32 %v527_v9 }
 0x1bd   :  { %v1224_v12 = vpop.eup %1223 }
 0x1be   :  { %v1226_v13 = vpop.eup %1225  ;;  %1034 = vmatprep.mubr.f32.mxu1 %v1224_v12 }
 0x1bf   :  { %1035 = vmatmul.mubr.f32.gmra.mrb[22].mxu1 %v1226_v13 }
 0x1c2   :  { %v983_v14 = vpop.f32.mrb[8].mxu1 }
 0x1c3   :  { %v537_v16 = vadd.f32 %v983_v14, %v1580_v54  ;;  %v531_v17 = vpop.f32.mrb[9].mxu1 }
 0x1c4   :  { %v532_v18 = vadd.f32 %v1580_v54, %v531_v17 }
 0x1c6   :  { %1227 = vtanh.f32 %v532_v18 }
 0x1c7   :  { %1229 = vtanh.f32 %v537_v16 }
 0x1d0   :  { %v1228_v19 = vpop.eup %1227 }
 0x1d1   :  { %v1230_v20 = vpop.eup %1229  ;;  %1037 = vmatprep.mubr.f32.mxu1 %v1228_v19 }
 0x1d2   :  { %1038 = vmatmul.mubr.f32.gmra.mrb[24].mxu1 %v1230_v20 }
 0x1d5   :  { %v986_v21 = vpop.f32.mrb[10].mxu1 }
 0x1d6   :  { %v547_v22 = vadd.f32 %v986_v21, %v1580_v54  ;;  %v541_v15 = vpop.f32.mrb[11].mxu1 }
 0x1d7   :  { %v542_v23 = vadd.f32 %v1580_v54, %v541_v15 }
 0x1d9   :  { %1231 = vtanh.f32 %v542_v23 }
 0x1da   :  { %1233 = vtanh.f32 %v547_v22 }
 0x1e3   :  { %v1232_v24 = vpop.eup %1231 }
 0x1e4   :  { %v1234_v25 = vpop.eup %1233  ;;  %1040 = vmatprep.mubr.f32.mxu1 %v1232_v24 }
 0x1e5   :  { %1041 = vmatmul.mubr.f32.gmra.mrb[26].mxu1 %v1234_v25 }
 0x1e8   :  { %v989_v26 = vpop.f32.mrb[12].mxu1 }
 0x1e9   :  { %v557_v27 = vadd.f32 %v989_v26, %v1580_v54  ;;  %v551_v28 = vpop.f32.mrb[13].mxu1 }
 0x1ea   :  { %v552_v29 = vadd.f32 %v1580_v54, %v551_v28 }
 0x1ec   :  { %1235 = vtanh.f32 %v552_v29 }
 0x1ed   :  { %1237 = vtanh.f32 %v557_v27 }
 0x1f6   :  { %v1236_v31 = vpop.eup %1235 }
 0x1f7   :  { %v1238_v32 = vpop.eup %1237  ;;  %1043 = vmatprep.mubr.f32.mxu1 %v1236_v31 }
 0x1f8   :  { %1044 = vmatmul.mubr.f32.gmra.mrb[28].mxu1 %v1238_v32 }
 0x1fb   :  { %v992_v33 = vpop.f32.mrb[14].mxu1 }
 0x1fc   :  { %v567_v34 = vadd.f32 %v992_v33, %v1580_v54  ;;  %v561_v35 = vpop.f32.mrb[15].mxu1 }
 0x1fd   :  { %v562_v36 = vadd.f32 %v1580_v54, %v561_v35  ;;  %v770_v35 = vld [vmem:[%s1643_s7] sm:$0xff] }
 0x1ff   :  { %1239 = vtanh.f32 %v562_v36  ;;  %v775_v36 = vpop.permute.xlu1 %774 }
 0x200   :  { %1241 = vtanh.f32 %v567_v34 }
 0x209   :  { %v1240_v37 = vpop.eup %1239 }
 0x20a   :  { %v1242_v38 = vpop.eup %1241  ;;  %1046 = vmatprep.mubr.f32.mxu1 %v1240_v37 }
 0x20b   :  { %1047 = vmatmul.mubr.f32.gmra.mrb[30].mxu1 %v1242_v38 }
 0x265   :  { %v1027_v40 = vpop.f32.mrb[16].mxu1 }
 0x266   :  { %v681_v41 = vadd.f32 %v1027_v40, %v1602_v39  ;;  %v675_v42 = vpop.f32.mrb[17].mxu1 }
 0x267   :  { %v676_v43 = vadd.f32 %v1602_v39, %v675_v42 }
 0x268   :  { %1243 = vtanh.f32 %v681_v41 }
 0x269   :  { %1245 = vtanh.f32 %v676_v43 }
 0x26c   :  { %v1030_v44 = vpop.f32.mrb[18].mxu1 }
 0x26d   :  { %v691_v45 = vadd.f32 %v1030_v44, %v1602_v39  ;;  %v685_v46 = vpop.f32.mrb[19].mxu1 }
 0x26e   :  { %v686_v47 = vadd.f32 %v1602_v39, %v685_v46 }
 0x26f   :  { %1247 = vtanh.f32 %v691_v45 }
 0x270   :  { %1249 = vtanh.f32 %v686_v47 }
 0x272   :  { %v1244_v49 = vpop.eup %1243 }
 0x273   :  { %v1246_v50 = vpop.eup %1245 }
 0x274   :  { %v1149_v52 = vpack.c.bf16 %v1244_v49, %v1246_v50 }
 0x276   :  { %1150 = vmatpush3.bf16.xpose.msra.mxu0 %v1149_v52 }
 0x277   :  { %1151 = vmatprep.subr.bf16.mxu0 %v1305_v30 }
 0x279   :  { %v1248_v54 = vpop.eup %1247 }
 0x27a   :  { %v1250_v55 = vpop.eup %1249 }
 0x27b   :  { %v1152_v58 = vpack.c.bf16 %v1248_v54, %v1250_v55 }
 0x27e   :  { %1153 = vmatpush3.bf16.xpose.msra.mxu0 %v1152_v58 }
 0x27f   :  { %v1033_v56 = vpop.f32.mrb[20].mxu1  ;;  %1154 = vmatprep.subr.bf16.mxu0 %v1305_v30 }
 0x280   :  { %v701_v60 = vadd.f32 %v1033_v56, %v1602_v39  ;;  %v695_v57 = vpop.f32.mrb[21].mxu1 }
 0x281   :  { %v696_v61 = vadd.f32 %v1602_v39, %v695_v57 }
 0x282   :  { %1251 = vtanh.f32 %v701_v60 }
 0x283   :  { %1253 = vtanh.f32 %v696_v61 }
 0x28c   :  { %v1252_v59 = vpop.eup %1251 }
 0x28d   :  { %v1254_v62 = vpop.eup %1253 }
 0x28e   :  { %v1155_v63 = vpack.c.bf16 %v1252_v59, %v1254_v62 }
 0x290   :  { %1156 = vmatpush3.bf16.xpose.msra.mxu0 %v1155_v63 }
 0x291   :  { %1157 = vmatprep.subr.bf16.mxu0 %v1305_v30 }
 0x292   :  { %v1036_v1 = vpop.f32.mrb[22].mxu1 }
 0x293   :  { %v711_v51 = vadd.f32 %v1036_v1, %v1602_v39  ;;  %v705_v3 = vpop.f32.mrb[23].mxu1 }
 0x294   :  { %v706_v4 = vadd.f32 %v1602_v39, %v705_v3 }
 0x295   :  { %1255 = vtanh.f32 %v711_v51 }
 0x296   :  { %1257 = vtanh.f32 %v706_v4 }
 0x29f   :  { %v1256_v5 = vpop.eup %1255 }
 0x2a0   :  { %v1258_v6 = vpop.eup %1257 }
 0x2a1   :  { %v1158_v7 = vpack.c.bf16 %v1256_v5, %v1258_v6 }
 0x2a3   :  { %1159 = vmatpush3.bf16.xpose.msra.mxu0 %v1158_v7 }
 0x2a4   :  { %1160 = vmatprep.subr.bf16.mxu0 %v1305_v30 }
 0x2a5   :  { %v1039_v2 = vpop.f32.mrb[24].mxu1 }
 0x2a6   :  { %v721_v8 = vadd.f32 %v1039_v2, %v1602_v39  ;;  %v715_v0 = vpop.f32.mrb[25].mxu1 }
 0x2a7   :  { %v716_v9 = vadd.f32 %v1602_v39, %v715_v0 }
 0x2a8   :  { %1259 = vtanh.f32 %v721_v8 }
 0x2a9   :  { %1261 = vtanh.f32 %v716_v9 }
 0x2b2   :  { %v1260_v10 = vpop.eup %1259 }
 0x2b3   :  { %v1262_v11 = vpop.eup %1261 }
 0x2b4   :  { %v1161_v12 = vpack.c.bf16 %v1260_v10, %v1262_v11 }
 0x2b6   :  { %1162 = vmatpush3.bf16.xpose.msra.mxu0 %v1161_v12 }
 0x2b7   :  { %1163 = vmatprep.subr.bf16.mxu0 %v1305_v30 }
 0x2b8   :  { %v1042_v13 = vpop.f32.mrb[26].mxu1 }
 0x2b9   :  { %v731_v14 = vadd.f32 %v1042_v13, %v1602_v39  ;;  %v725_v16 = vpop.f32.mrb[27].mxu1 }
 0x2ba   :  { %v726_v17 = vadd.f32 %v1602_v39, %v725_v16 }
 0x2bb   :  { %1263 = vtanh.f32 %v731_v14 }
 0x2bc   :  { %1265 = vtanh.f32 %v726_v17 }
 0x2c5   :  { %v1264_v18 = vpop.eup %1263 }
 0x2c6   :  { %v1266_v19 = vpop.eup %1265 }
 0x2c7   :  { %v1164_v20 = vpack.c.bf16 %v1264_v18, %v1266_v19 }
 0x2c9   :  { %1165 = vmatpush3.bf16.xpose.msra.mxu0 %v1164_v20 }
 0x2ca   :  { %1166 = vmatprep.subr.bf16.mxu0 %v1305_v30 }
 0x2cb   :  { %v1045_v21 = vpop.f32.mrb[28].mxu1 }
 0x2cc   :  { %v741_v22 = vadd.f32 %v1045_v21, %v1602_v39  ;;  %v735_v15 = vpop.f32.mrb[29].mxu1 }
 0x2cd   :  { %v736_v23 = vadd.f32 %v1602_v39, %v735_v15 }
 0x2ce   :  { %1267 = vtanh.f32 %v741_v22 }
 0x2cf   :  { %1269 = vtanh.f32 %v736_v23 }
 0x2d8   :  { %v1268_v24 = vpop.eup %1267 }
 0x2d9   :  { %v1270_v25 = vpop.eup %1269 }
 0x2da   :  { %v1167_v26 = vpack.c.bf16 %v1268_v24, %v1270_v25 }
 0x2dc   :  { %1168 = vmatpush3.bf16.xpose.msra.mxu0 %v1167_v26 }
 0x2dd   :  { %1169 = vmatprep.subr.bf16.mxu0 %v1305_v30 }
 0x2de   :  { %v1048_v27 = vpop.f32.mrb[30].mxu1 }
 0x2df   :  { %v751_v28 = vadd.f32 %v1048_v27, %v1602_v39  ;;  %v745_v29 = vpop.f32.mrb[31].mxu1 }
 0x2e0   :  { %v746_v31 = vadd.f32 %v1602_v39, %v745_v29 }
 0x2e1   :  { %1271 = vtanh.f32 %v751_v28 }
 0x2e2   :  { %1273 = vtanh.f32 %v746_v31 }
 0x2eb   :  { %v1272_v32 = vpop.eup %1271 }
 0x2ec   :  { %v1274_v33 = vpop.eup %1273 }
 0x2ed   :  { %v1170_v34 = vpack.c.bf16 %v1272_v32, %v1274_v33 }
 0x2ef   :  { %1171 = vmatpush3.bf16.xpose.msra.mxu0 %v1170_v34 }
 0x2f6   :  { %1082 = vmatmul.mubr.f32.vlgmr.msra.gmra.mrb[0].mxu0 %v770_v35 }
 0x3c9   :  { %v843_v37 = vpop.f32.mrb[0].mxu0 }
 0x3ca   :  { %v844_v30 = vadd.f32 %v843_v37, %v775_v36  ;;  %v1083_v38 = vpop.f32.mrb[1].mxu0 }
 0x3cc   :  { %847 = vst [vmem:[%s1645_s9] sm:$0xff] %v844_v30 }
 0x3cd   :  { %852 = vsyncpa [#allocation3], 1 }

</bundles_post_ra>
